<compile_context>
chip_gen: v7x
topology: tpu7x:2x2x1
jax: 0.10.0
libtpu: 0.0.40
codegen_flags: <defaults>
</compile_context>

<pallas_src>
import jax
import jax.numpy as jnp
from jax.experimental import pallas as pl
from jax.experimental.pallas import tpu as pltpu

F_IN, H1, H2, F_OUT = 2, 10, 20, 1
PAD = 128  # lane width; hidden feature dims are zero-padded to this


def _mlp_kernel(x_ref, w1_ref, b1_ref, w2_ref, b2_ref, w3_ref, b3_ref, o_ref):
    # x_ref: (TM, F_IN) f32      w1_ref: (F_IN, PAD) f32   b1_ref: (1, PAD) f32
    # w2_ref: (PAD, PAD) bf16    b2_ref: (1, PAD) f32
    # w3_ref: (1, PAD) f32       b3_ref: (1, 1) f32        o_ref: (TM, F_OUT) f32
    x = x_ref[...]
    w1 = w1_ref[...]

    # Layer 1 (K = 2): two VPU broadcast-FMAs, no MXU pass needed.
    z1 = x[:, 0:1] * w1[0:1, :] + x[:, 1:2] * w1[1:2, :] + b1_ref[...]
    a1 = jnp.maximum(z1, 0.0)                    # ReLU; dropout_1 == identity (eval)

    # Layer 2: single MXU matmul, bf16 inputs, f32 accumulation.
    z2 = jnp.dot(a1.astype(jnp.bfloat16), w2_ref[...],
                 preferred_element_type=jnp.float32) + b2_ref[...]
    a2 = jnp.maximum(z2, 0.0)                    # ReLU; dropout_2 == identity (eval)

    # Layer 3 (out_features = 1): lane reduction instead of a K=128 matmul.
    y = jnp.sum(a2 * w3_ref[...], axis=-1, keepdims=True) + b3_ref[...]
    o_ref[...] = y                                # (TM, 1) — lane-masked store


def _pad_to(a, shape):
    out = jnp.zeros(shape, a.dtype)
    return out.at[: a.shape[0], : a.shape[1]].set(a)


def pack_params(params):
    """Pad / cast the weights ONCE (not per forward call)."""
    (w1, b1), (w2, b2), (w3, b3) = params
    w1_p = _pad_to(w1, (F_IN, PAD))                         # (2, 128)   f32
    b1_p = _pad_to(b1[None, :], (1, PAD))                   # (1, 128)   f32
    w2_p = _pad_to(w2, (PAD, PAD)).astype(jnp.bfloat16)     # (128, 128) bf16
    b2_p = _pad_to(b2[None, :], (1, PAD))                   # (1, 128)   f32
    w3_p = _pad_to(w3.T, (1, PAD))                          # (1, 128)   f32
    b3_p = b3.reshape(1, 1).astype(jnp.float32)             # (1, 1)     f32
    return (w1_p, b1_p, w2_p, b2_p, w3_p, b3_p)


def _choose_tm(n):
    """Large batch tile (amortizes ~0.35 us/step); keep >=2 grid steps at big N."""
    n8 = ((n + 7) // 8) * 8
    if n8 <= 1024:
        return n8
    return 512


def nnet_layers_forward(x, packed):
    """x: (N, 2) float32 -> (N, 1) float32.  Any batch size N."""
    n = x.shape[0]
    tm = _choose_tm(n)
    n_pad = pl.cdiv(n, tm) * tm
    x_p = x if n_pad == n else jnp.pad(x, ((0, n_pad - n), (0, 0)))

    const = lambda i: (0, 0)
    out = pl.pallas_call(
        _mlp_kernel,
        out_shape=jax.ShapeDtypeStruct((n_pad, F_OUT), jnp.float32),
        grid_spec=pl.GridSpec(
            grid=(n_pad // tm,),
            in_specs=[
                pl.BlockSpec((tm, F_IN), lambda i: (i, 0)),  # x tile, unpadded lanes
                pl.BlockSpec((F_IN, PAD), const),            # w1
                pl.BlockSpec((1, PAD), const),               # b1
                pl.BlockSpec((PAD, PAD), const),             # w2 (bf16)
                pl.BlockSpec((1, PAD), const),               # b2
                pl.BlockSpec((1, PAD), const),               # w3 (transposed row)
                pl.BlockSpec((1, 1), const),                 # b3
            ],
            out_specs=pl.BlockSpec((tm, F_OUT), lambda i: (i, 0)),
        ),
        compiler_params=pltpu.CompilerParams(
            dimension_semantics=("parallel",)),
    )(x_p, *packed)

    return out[:n]


def init_params(key):
    """Deterministic parameter init (shapes match the PyTorch module)."""
    ks = jax.random.split(key, 6)
    # Stored as (in_features, out_features) so the math is x @ W + b,
    # equivalent to PyTorch's x @ W^T + b with W of shape (out, in).
    w1 = jax.random.normal(ks[0], (F_IN, H1), jnp.float32) * 0.5
    b1 = jax.random.normal(ks[1], (H1,), jnp.float32) * 0.1
    w2 = jax.random.normal(ks[2], (H1, H2), jnp.float32) * 0.5
    b2 = jax.random.normal(ks[3], (H2,), jnp.float32) * 0.1
    w3 = jax.random.normal(ks[4], (H2, F_OUT), jnp.float32) * 0.5
    b3 = jax.random.normal(ks[5], (F_OUT,), jnp.float32) * 0.1
    return (w1, b1), (w2, b2), (w3, b3)


def reference_forward(x, params, bf16_matmul=False):
    """Pure-JAX reference. bf16_matmul=True emulates the kernel's MXU path."""
    (w1, b1), (w2, b2), (w3, b3) = params
    a1 = jnp.maximum(x @ w1 + b1, 0.0)
    if bf16_matmul:
        z2 = jnp.dot(a1.astype(jnp.bfloat16), w2.astype(jnp.bfloat16),
                     preferred_element_type=jnp.float32) + b2
    else:
        z2 = a1 @ w2 + b2
    a2 = jnp.maximum(z2, 0.0)
    return a2 @ w3 + b3


if __name__ == "__main__":
    key = jax.random.PRNGKey(0)
    pkey, xkey_small, xkey_large = jax.random.split(key, 3)
    params = init_params(pkey)
    packed = pack_params(params)

    fwd = jax.jit(nnet_layers_forward)

    # Two batches: a small ragged one (exercises cdiv + row padding, 1 grid
    # step) and a larger one (exercises TM=512 with a multi-step grid).
    for n, xkey in ((37, xkey_small), (1200, xkey_large)):
        x = jax.random.normal(xkey, (n, F_IN), jnp.float32)
        y = jax.block_until_ready(fwd(x, packed))
        assert y.shape == (n, F_OUT)

        # Tight check vs a reference that emulates the bf16 MXU path.
        y_bf16 = reference_forward(x, params, bf16_matmul=True)
        assert jnp.allclose(y, y_bf16, atol=1e-2, rtol=1e-2), "mismatch vs bf16 reference"

        # Looser check vs the exact f32 reference (tolerance accounts for the
        # bf16 layer-2 matmul inputs).
        y_f32 = reference_forward(x, params, bf16_matmul=False)
        assert jnp.allclose(y, y_f32, atol=1e-1, rtol=1e-1), "mismatch vs f32 reference"

    print("KERNEL_OK")
</pallas_src>

<mosaic_0001>
module attributes {stable_mosaic.version = 11 : i64} {
  func.func @_mlp_kernel(%arg0: i32, %arg1: memref<40x2xf32, #tpu.memory_space<vmem>>, %arg2: memref<2x128xf32, #tpu.memory_space<vmem>>, %arg3: memref<1x128xf32, #tpu.memory_space<vmem>>, %arg4: memref<128x128xbf16, #tpu.memory_space<vmem>>, %arg5: memref<1x128xf32, #tpu.memory_space<vmem>>, %arg6: memref<1x128xf32, #tpu.memory_space<vmem>>, %arg7: memref<1x1xf32, #tpu.memory_space<vmem>>, %arg8: memref<40x1xf32, #tpu.memory_space<vmem>>) attributes {dimension_semantics = [#tpu.dimension_semantics<parallel>], iteration_bounds = array<i64: 1>, scalar_prefetch = 0 : i64, scratch_operands = 0 : i64, tpu.core_type = #tpu.core_type<tc>, window_params = [{transform_indices = @transform_0, window_bounds = array<i64: 40, 2>}, {pipeline_mode = #tpu.pipeline_mode<synchronous>, transform_indices = @transform_1, window_bounds = array<i64: 2, 128>}, {pipeline_mode = #tpu.pipeline_mode<synchronous>, transform_indices = @transform_2, window_bounds = array<i64: 1, 128>}, {pipeline_mode = #tpu.pipeline_mode<synchronous>, transform_indices = @transform_3, window_bounds = array<i64: 128, 128>}, {pipeline_mode = #tpu.pipeline_mode<synchronous>, transform_indices = @transform_4, window_bounds = array<i64: 1, 128>}, {pipeline_mode = #tpu.pipeline_mode<synchronous>, transform_indices = @transform_5, window_bounds = array<i64: 1, 128>}, {pipeline_mode = #tpu.pipeline_mode<synchronous>, transform_indices = @transform_6, window_bounds = array<i64: 1, 1>}, {transform_indices = @transform_7, window_bounds = array<i64: 40, 1>}]} {
    %c0 = arith.constant 0 : index
    %c0_0 = arith.constant 0 : index
    %0 = vector.load %arg1[%c0, %c0_0] : memref<40x2xf32, #tpu.memory_space<vmem>>, vector<40x2xf32>
    %c0_1 = arith.constant 0 : index
    %c0_2 = arith.constant 0 : index
    %1 = vector.load %arg2[%c0_1, %c0_2] : memref<2x128xf32, #tpu.memory_space<vmem>>, vector<2x128xf32>
    %2 = vector.extract_strided_slice %0 {offsets = [0, 0], sizes = [40, 1], strides = [1, 1]} : vector<40x2xf32> to vector<40x1xf32>
    %3 = vector.extract_strided_slice %1 {offsets = [0, 0], sizes = [1, 128], strides = [1, 1]} : vector<2x128xf32> to vector<1x128xf32>
    %4 = vector.broadcast %2 : vector<40x1xf32> to vector<40x128xf32>
    %5 = vector.broadcast %3 : vector<1x128xf32> to vector<40x128xf32>
    %6 = arith.mulf %4, %5 : vector<40x128xf32>
    %7 = vector.extract_strided_slice %0 {offsets = [0, 1], sizes = [40, 1], strides = [1, 1]} : vector<40x2xf32> to vector<40x1xf32>
    %8 = vector.extract_strided_slice %1 {offsets = [1, 0], sizes = [1, 128], strides = [1, 1]} : vector<2x128xf32> to vector<1x128xf32>
    %9 = vector.broadcast %7 : vector<40x1xf32> to vector<40x128xf32>
    %10 = vector.broadcast %8 : vector<1x128xf32> to vector<40x128xf32>
    %11 = arith.mulf %9, %10 : vector<40x128xf32>
    %12 = arith.addf %6, %11 : vector<40x128xf32>
    %c0_3 = arith.constant 0 : index
    %c0_4 = arith.constant 0 : index
    %13 = vector.load %arg3[%c0_3, %c0_4] : memref<1x128xf32, #tpu.memory_space<vmem>>, vector<1x128xf32>
    %14 = vector.broadcast %13 : vector<1x128xf32> to vector<40x128xf32>
    %15 = arith.addf %12, %14 : vector<40x128xf32>
    %cst = arith.constant 0.000000e+00 : f32
    %16 = vector.broadcast %cst : f32 to vector<40x128xf32>
    %17 = arith.maximumf %15, %16 : vector<40x128xf32>
    %18 = arith.truncf %17 : vector<40x128xf32> to vector<40x128xbf16>
    %c0_5 = arith.constant 0 : index
    %c0_6 = arith.constant 0 : index
    %19 = vector.load %arg4[%c0_5, %c0_6] : memref<128x128xbf16, #tpu.memory_space<vmem>>, vector<128x128xbf16>
    %cst_7 = arith.constant dense<0.000000e+00> : vector<40x128xf32>
    %20 = tpu.matmul %18, %19, %cst_7 {dimension_numbers = #tpu.dot_dimension_numbers<[1], [0], [0], [1], [0, 0, 1, 1], [], []>} : vector<40x128xbf16>, vector<128x128xbf16>, vector<40x128xf32> -> vector<40x128xf32>
    %c0_8 = arith.constant 0 : index
    %c0_9 = arith.constant 0 : index
    %21 = vector.load %arg5[%c0_8, %c0_9] : memref<1x128xf32, #tpu.memory_space<vmem>>, vector<1x128xf32>
    %22 = vector.broadcast %21 : vector<1x128xf32> to vector<40x128xf32>
    %23 = arith.addf %20, %22 : vector<40x128xf32>
    %cst_10 = arith.constant 0.000000e+00 : f32
    %24 = vector.broadcast %cst_10 : f32 to vector<40x128xf32>
    %25 = arith.maximumf %23, %24 : vector<40x128xf32>
    %c0_11 = arith.constant 0 : index
    %c0_12 = arith.constant 0 : index
    %26 = vector.load %arg6[%c0_11, %c0_12] : memref<1x128xf32, #tpu.memory_space<vmem>>, vector<1x128xf32>
    %27 = vector.broadcast %26 : vector<1x128xf32> to vector<40x128xf32>
    %28 = arith.mulf %25, %27 : vector<40x128xf32>
    %cst_13 = arith.constant dense<0.000000e+00> : vector<40xf32>
    %29 = vector.multi_reduction <add>, %28, %cst_13 [1] : vector<40x128xf32> to vector<40xf32>
    %30 = vector.shape_cast %29 : vector<40xf32> to vector<40x1xf32>
    %c0_14 = arith.constant 0 : index
    %c0_15 = arith.constant 0 : index
    %31 = vector.load %arg7[%c0_14, %c0_15] : memref<1x1xf32, #tpu.memory_space<vmem>>, vector<1x1xf32>
    %32 = vector.broadcast %31 : vector<1x1xf32> to vector<40x1xf32>
    %33 = arith.addf %30, %32 : vector<40x1xf32>
    %c0_16 = arith.constant 0 : index
    %c0_17 = arith.constant 0 : index
    %34 = vector.load %arg8[%c0_16, %c0_17] : memref<40x1xf32, #tpu.memory_space<vmem>>, vector<40x1xf32>
    tpu.vector_store %arg8[%c0_16, %c0_17], %33 {strides = array<i32>} : memref<40x1xf32, #tpu.memory_space<vmem>>, vector<40x1xf32>,
    return
  }
  func.func @transform_0(%arg0: i32) -> (i32, i32) {
    %c0_i32 = arith.constant 0 : i32
    %c0_i32_0 = arith.constant 0 : i32
    return %arg0, %c0_i32 : i32, i32
  }
  func.func @transform_1(%arg0: i32) -> (i32, i32) {
    %c0_i32 = arith.constant 0 : i32
    %c0_i32_0 = arith.constant 0 : i32
    %c0_i32_1 = arith.constant 0 : i32
    return %c0_i32, %c0_i32_0 : i32, i32
  }
  func.func @transform_2(%arg0: i32) -> (i32, i32) {
    %c0_i32 = arith.constant 0 : i32
    %c0_i32_0 = arith.constant 0 : i32
    %c0_i32_1 = arith.constant 0 : i32
    return %c0_i32, %c0_i32_0 : i32, i32
  }
  func.func @transform_3(%arg0: i32) -> (i32, i32) {
    %c0_i32 = arith.constant 0 : i32
    %c0_i32_0 = arith.constant 0 : i32
    %c0_i32_1 = arith.constant 0 : i32
    return %c0_i32, %c0_i32_0 : i32, i32
  }
  func.func @transform_4(%arg0: i32) -> (i32, i32) {
    %c0_i32 = arith.constant 0 : i32
    %c0_i32_0 = arith.constant 0 : i32
    %c0_i32_1 = arith.constant 0 : i32
    return %c0_i32, %c0_i32_0 : i32, i32
  }
  func.func @transform_5(%arg0: i32) -> (i32, i32) {
    %c0_i32 = arith.constant 0 : i32
    %c0_i32_0 = arith.constant 0 : i32
    %c0_i32_1 = arith.constant 0 : i32
    return %c0_i32, %c0_i32_0 : i32, i32
  }
  func.func @transform_6(%arg0: i32) -> (i32, i32) {
    %c0_i32 = arith.constant 0 : i32
    %c0_i32_0 = arith.constant 0 : i32
    %c0_i32_1 = arith.constant 0 : i32
    return %c0_i32, %c0_i32_0 : i32, i32
  }
  func.func @transform_7(%arg0: i32) -> (i32, i32) {
    %c0_i32 = arith.constant 0 : i32
    %c0_i32_0 = arith.constant 0 : i32
    return %arg0, %c0_i32 : i32, i32
  }
}

</mosaic_0001>

<bundles_post_ra>
// kernel: nnet_layers_forward.1
= control target key start
LH: loop header
LB: loop body
LE: loop exit
PB: predicated region body
PF: predicated region fallthrough
CT: control target
= control target key end

     0   :  { %v384_v0 = vmov 1   ;;  %v385_v1 = vmov 0   ;;  %v386_v4 = vmov 0.0   ;;  %vm387_vm0 = vmmov 0   ;;  %s519_s0 = inlined_call_operand.vmem [shape: f32[40,2], index: 0, kind: input, shape index: {}]   ;;  %s520_s3 = inlined_call_operand.vmem [shape: bf16[128,128], index: 3, kind: input, shape index: {}]   ;;  %s521_s1 = inlined_call_operand.vmem [shape: f32[2,128], index: 1, kind: input, shape index: {}]   ;;  %s522_s2 = inlined_call_operand.vmem [shape: f32[1,128], index: 2, kind: input, shape index: {}]   ;;  %s523_s6 = inlined_call_operand.<no memory space> [shape: f32[1,1], index: 6, kind: input, shape index: {}]   ;;  %s524_s4 = inlined_call_operand.vmem [shape: f32[1,128], index: 4, kind: input, shape index: {}]   ;;  %s525_s5 = inlined_call_operand.vmem [shape: f32[1,128], index: 5, kind: input, shape index: {}]   ;;  %s526_s7 = inlined_call_operand.vmem [shape: f32[40,1], index: 7, kind: output, shape index: {}]  }
   0x1   :  { %371 = vset.pattern.permute.xlu1 %v384_v0  ;;  %370 = vset.pattern.permute.xlu0 %v385_v1  ;;  %v31_v2 = vld [vmem:[%s519_s0 + $0x10] sm:$0xff]  ;;  %v32_v3 = vld [vmem:[%s519_s0 + $0x18] sm:$0xff]  ;;  %v376_v5 = vld [vmem:[%s520_s3] sm:$0xff]   ;;  %v60_v16 = vlaneseq  ;;  %v12_v62 = vstv %s523_s6  ;;  %vm289_vm1 = vcmask 7168  }
   0x2   :  { %78 = vperm.xlu1 %371, %v31_v2   ;;  %47 = vperm.xlu0 %370, %v31_v2   ;;  %v377_v6 = vld [vmem:[%s520_s3 + $0x8] sm:$0xff]   ;;  %v29_v7 = vld [vmem:[%s519_s0] sm:$0xff]  ;;  %v378_v9 = vld [vmem:[%s520_s3 + $0x10] sm:$0xff]   ;;  %13 = vst [vmem:[#allocation2] sm:$0x1] %v12_v62 }
   0x3   :  { %350 = vmatprep.subr.bf16.mxu1 %v386_v4  ;;  %322 = vmatprep.subr.bf16.mxu0 %v386_v4  ;;  %v30_v8 = vld [vmem:[%s519_s0 + $0x8] sm:$0xff]  ;;  %v379_v10 = vld [vmem:[%s520_s3 + $0x18] sm:$0xff]   ;;  %v33_v11 = vld [vmem:[%s519_s0 + $0x20] sm:$0xff]  ;;  %v61_v17 = vshrl.u32 %v60_v16, 7 }
   0x4   :  { %358 = vmatpush3.bf16.msra.mxu1 %v376_v5  ;;  %323 = vmatpush3.bf16.msra.mxu0 %v376_v5  ;;  %v380_v12 = vld [vmem:[%s520_s3 + $0x20] sm:$0xff]   ;;  %v381_v13 = vld [vmem:[%s520_s3 + $0x28] sm:$0xff]   ;;  %v382_v14 = vld [vmem:[%s520_s3 + $0x30] sm:$0xff]  }
   0x5   :  { %351 = vmatprep.subr.bf16.mxu1 %v386_v4  ;;  %324 = vmatprep.subr.bf16.mxu0 %v386_v4  ;;  %v383_v15 = vld [vmem:[%s520_s3 + $0x38] sm:$0xff]   ;;  %v91_v18 = vsub.s32 1, %v61_v17  ;;  %v62_v19 = vsub.s32 0, %v61_v17  ;;  %v34_v20 = vld [vmem:[%s521_s1] sm:$0x3] }
   0x6   :  { %82 = vperm.xlu1 %371, %v32_v3   ;;  %52 = vperm.xlu0 %370, %v32_v3   ;;  %v299_v28 = vld [vmem:[%s522_s2] ss:$0 sm:$0xff] }
   0x7   :  { %342 = vmatprep.mubr.msk.bf16.mxu1 %vm387_vm0, %v386_v4  ;;  %338 = vmatprep.mubr.msk.bf16.mxu0 %vm387_vm0, %v386_v4  ;;  %v92_v21 = vrot.slane %v34_v20, %v91_v18  ;;  %v63_v22 = vrot.slane %v34_v20, %v62_v19  ;;  %v300_v63 = vld [vmem:[%s524_s4] ss:$0 sm:$0xff] }
   0x8   :  { %359 = vmatpush3.bf16.msra.mxu1 %v377_v6  ;;  %325 = vmatpush3.bf16.msra.mxu0 %v377_v6 }
   0x9   :  { %352 = vmatprep.subr.bf16.mxu1 %v386_v4  ;;  %326 = vmatprep.subr.bf16.mxu0 %v386_v4 }
   0xa   :  { %372 = vset.pattern.permute.xlu1 %v385_v1  ;;  %37 = vperm.xlu0 %370, %v29_v7  }
   0xb   :  { %42 = vperm.xlu1 %372, %v30_v8  }
   0xc   :  { %360 = vmatpush3.bf16.msra.mxu1 %v378_v9  ;;  %327 = vmatpush3.bf16.msra.mxu0 %v378_v9 }
   0xd   :  { %353 = vmatprep.subr.bf16.mxu1 %v386_v4  ;;  %328 = vmatprep.subr.bf16.mxu0 %v386_v4 }
   0xe   :  { %373 = vset.pattern.permute.xlu0 %v384_v0 }
   0xf   :  { %374 = vset.pattern.permute.xlu1 %v384_v0  ;;  %70 = vperm.xlu0 %373, %v29_v7  }
  0x10   :  { %74 = vperm.xlu1 %374, %v30_v8   ;;  %361 = vmatpush3.bf16.msra.mxu1 %v379_v10 }
  0x11   :  { %329 = vmatpush3.bf16.msra.mxu0 %v379_v10  ;;  %354 = vmatprep.subr.bf16.mxu1 %v386_v4 }
  0x12   :  { %330 = vmatprep.subr.bf16.mxu0 %v386_v4 }
  0x13   :  { %86 = vperm.xlu0 %373, %v33_v11  }
  0x14   :  { %375 = vset.pattern.permute.xlu1 %v385_v1  ;;  %362 = vmatpush3.bf16.msra.mxu1 %v380_v12 }
  0x15   :  { %57 = vperm.xlu1 %375, %v33_v11   ;;  %355 = vmatprep.subr.bf16.mxu1 %v386_v4 }
  0x16   :  { %331 = vmatpush3.bf16.msra.mxu0 %v380_v12 }
  0x17   :  { %332 = vmatprep.subr.bf16.mxu0 %v386_v4 }
  0x18   :  { %363 = vmatpush3.bf16.msra.mxu1 %v381_v13 }
  0x19   :  { %356 = vmatprep.subr.bf16.mxu1 %v386_v4 }
  0x1a   :  { %333 = vmatpush3.bf16.msra.mxu0 %v381_v13 }
  0x1b   :  { %334 = vmatprep.subr.bf16.mxu0 %v386_v4 }
  0x1c   :  { %364 = vmatpush3.bf16.msra.mxu1 %v382_v14 }
  0x1d   :  { %357 = vmatprep.subr.bf16.mxu1 %v386_v4 }
  0x1e   :  { %335 = vmatpush3.bf16.msra.mxu0 %v382_v14 }
  0x1f   :  { %336 = vmatprep.subr.bf16.mxu0 %v386_v4 }
  0x20   :  { %365 = vmatpush3.bf16.msra.mxu1 %v383_v15 }
  0x22   :  { %337 = vmatpush3.bf16.msra.mxu0 %v383_v15 }
  0x81   :  { %v79_v23 = vpop.permute.xlu1 %78  ;;  %v48_v24 = vpop.permute.xlu0 %47 }
  0x82   :  { %v95_v25 = vmul.f32 %v92_v21, %v79_v23  ;;  %v66_v26 = vmul.f32 %v63_v22, %v48_v24 }
  0x84   :  { %v100_v27 = vadd.f32 %v95_v25, %v66_v26 }
  0x85   :  { %v83_v29 = vpop.permute.xlu1 %82  ;;  %v53_v30 = vpop.permute.xlu0 %52 }
  0x86   :  { %v96_v31 = vmul.f32 %v92_v21, %v83_v29  ;;  %v67_v32 = vmul.f32 %v63_v22, %v53_v30  ;;  %v112_v33 = vadd.f32 %v299_v28, %v100_v27 }
  0x88   :  { %v101_v34 = vadd.f32 %v96_v31, %v67_v32  ;;  %v117_v38 = vmax.f32 %v112_v33, 0.0 }
  0x89   :  { %v38_v35 = vpop.permute.xlu0 %37 }
  0x8a   :  { %v113_v36 = vadd.f32 %v299_v28, %v101_v34  ;;  %v43_v37 = vpop.permute.xlu1 %42  ;;  %v64_v42 = vmul.f32 %v63_v22, %v38_v35 }
  0x8b   :  { %v65_v45 = vmul.f32 %v63_v22, %v43_v37 }
  0x8c   :  { %v118_v39 = vmax.f32 %v113_v36, 0.0 }
  0x8e   :  { %v71_v40 = vpop.permute.xlu0 %70  ;;  %v121_v41 = vpack.c.bf16 %v118_v39, %v117_v38 }
  0x8f   :  { %v93_v43 = vmul.f32 %v92_v21, %v71_v40  ;;  %v75_v44 = vpop.permute.xlu1 %74 }
  0x90   :  { %v94_v46 = vmul.f32 %v92_v21, %v75_v44  ;;  %343 = vmatmul.mubr.bf16.vlgmr.msra.gmra.mrb[0].mxu1 %v121_v41 }
  0x91   :  { %v98_v47 = vadd.f32 %v93_v43, %v64_v42  ;;  %346 = vmatprep.mubr.msk.bf16.mxu1 %vm387_vm0, %v386_v4  ;;  %v309_v4 = vld [vmem:[%s525_s5] ss:$0 sm:$0xff] }
  0x92   :  { %v99_v48 = vadd.f32 %v94_v46, %v65_v45  ;;  %v87_v49 = vpop.permute.xlu0 %86 }
  0x93   :  { %v110_v50 = vadd.f32 %v299_v28, %v98_v47  ;;  %v97_v54 = vmul.f32 %v92_v21, %v87_v49 }
  0x94   :  { %v111_v51 = vadd.f32 %v299_v28, %v99_v48  ;;  %v58_v52 = vpop.permute.xlu1 %57 }
  0x95   :  { %v115_v53 = vmax.f32 %v110_v50, 0.0  ;;  %v68_v55 = vmul.f32 %v63_v22, %v58_v52 }
  0x96   :  { %v116_v56 = vmax.f32 %v111_v51, 0.0 }
  0x97   :  { %v102_v57 = vadd.f32 %v97_v54, %v68_v55 }
  0x98   :  { %v120_v58 = vpack.c.bf16 %v116_v56, %v115_v53 }
  0x99   :  { %v114_v59 = vadd.f32 %v299_v28, %v102_v57  ;;  %v310_v28 = vld [vmem:[#allocation2] ss:$0 sm:$0xff] }
  0x9a   :  { %339 = vmatmul.mubr.bf16.vlgmr.msra.gmra.mrb[0].mxu0 %v120_v58 }
  0x9b   :  { %v119_v60 = vmax.f32 %v114_v59, 0.0 }
  0x9d   :  { %v122_v61 = vpack.c.bf16 %v119_v60, %v119_v60 }
  0x9f   :  { %347 = vmatmul.mubr.bf16.gmra.mrb[4].mxu1 %v122_v61 }
 0x163   :  { %v236_v0 = vpop.f32.mrb[0].mxu1 }
 0x164   :  { %v237_v1 = vadd.f32 %v300_v63, %v236_v0  ;;  %v344_v2 = vpop.f32.mrb[1].mxu1 }
 0x165   :  { %v239_v3 = vpop.f32.mrb[2].mxu1 }
 0x166   :  { %v252_v5 = vmax.f32 %v237_v1, 0.0  ;;  %v345_v6 = vpop.f32.mrb[3].mxu1  ;;  %v240_v9 = vadd.f32 %v300_v63, %v239_v3 }
 0x168   :  { %v264_v7 = vmul.f32 %v309_v4, %v252_v5  ;;  %v253_v16 = vmax.f32 %v240_v9, 0.0 }
 0x16a   :  { %271 = vadd.xlane.f32.xlu0 %v264_v7  ;;  %v265_v26 = vmul.f32 %v309_v4, %v253_v16 }
 0x16d   :  { %v228_v8 = vpop.f32.mrb[0].mxu0 }
 0x16e   :  { %v229_v10 = vadd.f32 %v300_v63, %v228_v8  ;;  %v340_v11 = vpop.f32.mrb[1].mxu0 }
 0x16f   :  { %v231_v12 = vpop.f32.mrb[2].mxu0 }
 0x170   :  { %v250_v13 = vmax.f32 %v229_v10, 0.0  ;;  %v232_v14 = vadd.f32 %v300_v63, %v231_v12  ;;  %v341_v15 = vpop.f32.mrb[3].mxu0 }
 0x172   :  { %v251_v17 = vmax.f32 %v232_v14, 0.0  ;;  %v244_v18 = vpop.f32.mrb[4].mxu1  ;;  %v262_v19 = vmul.f32 %v309_v4, %v250_v13 }
 0x173   :  { %v245_v20 = vadd.f32 %v300_v63, %v244_v18  ;;  %v348_v21 = vpop.f32.mrb[5].mxu1 }
 0x174   :  { %267 = vadd.xlane.f32.xlu1 %v262_v19  ;;  %v247_v22 = vpop.f32.mrb[6].mxu1  ;;  %v263_v23 = vmul.f32 %v309_v4, %v251_v17 }
 0x175   :  { %v254_v24 = vmax.f32 %v245_v20, 0.0  ;;  %v349_v25 = vpop.f32.mrb[7].mxu1 }
 0x176   :  { %269 = vadd.xlane.f32.xlu0 %v263_v23 }
 0x177   :  { %v266_v27 = vmul.f32 %v309_v4, %v254_v24 }
 0x178   :  { %273 = vadd.xlane.f32.xlu1 %v265_v26 }
 0x17a   :  { %275 = vadd.xlane.f32.xlu0 %v266_v27 }
 0x1f7   :  { %v272_v29 = vpop.xlane.xlu0 %271 }
 0x1f8   :  { %v286_v30 = vadd.f32 %v310_v28, %v272_v29 }
 0x1fa   :  { %292 = vst.msk [vmem:[%s526_s7 + $0x10] sm:$0xff] %vm289_vm1, %v286_v30 }
 0x201   :  { %v268_v31 = vpop.xlane.xlu1 %267 }
 0x202   :  { %v284_v32 = vadd.f32 %v310_v28, %v268_v31 }
 0x203   :  { %v270_v33 = vpop.xlane.xlu0 %269 }
 0x204   :  { %290 = vst.msk [vmem:[%s526_s7] sm:$0xff] %vm289_vm1, %v284_v32  ;;  %v285_v34 = vadd.f32 %v310_v28, %v270_v33 }
 0x205   :  { %v274_v35 = vpop.xlane.xlu1 %273 }
 0x206   :  { %291 = vst.msk [vmem:[%s526_s7 + $0x8] sm:$0xff] %vm289_vm1, %v285_v34  ;;  %v287_v36 = vadd.f32 %v310_v28, %v274_v35 }
 0x207   :  { %v276_v37 = vpop.xlane.xlu0 %275 }
 0x208   :  { %293 = vst.msk [vmem:[%s526_s7 + $0x18] sm:$0xff] %vm289_vm1, %v287_v36  ;;  %v288_v38 = vadd.f32 %v310_v28, %v276_v37 }
 0x20a   :  { %294 = vst.msk [vmem:[%s526_s7 + $0x20] sm:$0xff] %vm289_vm1, %v288_v38 }

</bundles_post_ra>
